<compile_context>
chip_gen: v7x
topology: tpu7x:2x2x1
jax: 0.10.0
libtpu: 0.0.40
codegen_flags: <defaults>
</compile_context>

<pallas_src>
import jax
import jax.numpy as jnp
from jax.experimental import pallas as pl
from jax.experimental.pallas import tpu as pltpu


def _make_maxlen_kernel(c):
    """Elementwise kernel: out = x + c, with c = 3 - kmer baked in at trace time."""

    def kernel(x_ref, o_ref):
        o_ref[...] = x_ref[...] + c

    return kernel


def _choose_layout(n_elems, itemsize, block_bytes, max_lanes):
    """Pick a lane-dense (rows, L) reshape and a block_rows tile for it.

    Returns (rows, L, block_rows) or None if no legal lane-dense layout exists
    (caller falls back to plain jnp).
    """
    # Sublane multiple for this dtype: 8 for 4-byte, 16 for 2-byte, 32 for 1-byte.
    sub = 8 * (4 // itemsize)

    # Lane width: largest multiple of 128 dividing n_elems, capped at max_lanes,
    # preferring one whose row count is a multiple of `sub` (so block_rows can
    # be tile-aligned without using the whole array as one block).
    best_l = None
    chosen_l = None
    for k in range(min(max_lanes, n_elems) // 128, 0, -1):
        lanes = 128 * k
        if n_elems % lanes:
            continue
        if best_l is None:
            best_l = lanes
        if (n_elems // lanes) % sub == 0:
            chosen_l = lanes
            break
    if best_l is None:
        return None  # not lane-dense-able; use the jnp fast path
    lanes = chosen_l if chosen_l is not None else best_l
    rows = n_elems // lanes

    # Block rows: largest divisor of rows that is a multiple of `sub`, fits in
    # ~block_bytes, and (when the shape allows) leaves >= 2 grid steps so both
    # v7x TensorCores participate.
    cap = max(1, (block_bytes // itemsize) // lanes)
    if rows >= 2 * sub:
        cap = min(cap, rows // 2)
    block_rows = None
    for d in range(min(cap, rows), 0, -1):
        if rows % d == 0 and d % sub == 0:
            block_rows = d
            break
    if block_rows is None:
        block_rows = rows  # single full block (equal-to-full-dim is legal)

    # Safety: never hand Pallas a block that could blow scoped VMEM.
    if block_rows * lanes * itemsize > 8 * 1024 * 1024:
        return None
    return rows, lanes, block_rows


def base_encoder_max_len(
    max_seq_len_batch,
    kmer,
    max_len=None,
    *,
    block_bytes=3 * 1024 * 1024,
    max_lanes=16384,
    small_threshold_bytes=256 * 1024,
    force_kernel=False,
):
    """Replicates BaseEncoder.__init__ max_len logic for a batch of seq lens.

    - If `max_len` is given, the branch resolves at trace time (Python `if`),
      exactly like the original __init__; no kernel is launched.
    - Otherwise max_seq_len - kmer + 1 + 2 is computed.  Small inputs use plain
      jnp (launch overhead dominates); larger inputs are flattened to a
      lane-dense slab and processed by a tiled Pallas kernel.
    """
    if max_len is not None:
        # Trace-time branch of BaseEncoder.__init__ (max_len given explicitly).
        return jnp.asarray(max_len, dtype=jnp.int32)

    c = 3 - int(kmer)  # = -kmer + 1 + 2
    x = max_seq_len_batch
    itemsize = x.dtype.itemsize
    n_bytes = x.size * itemsize

    if not force_kernel and n_bytes < small_threshold_bytes:
        # Tiny input: a fused XLA elementwise op beats any pallas_call overhead.
        return x + c

    layout = _choose_layout(x.size, itemsize, block_bytes, max_lanes)
    if layout is None:
        return x + c
    rows, lanes, block_rows = layout

    x2d = x.reshape(rows, lanes)  # contiguous row-major flatten; free reshape
    grid = (rows // block_rows,)

    out2d = pl.pallas_call(
        _make_maxlen_kernel(c),
        out_shape=jax.ShapeDtypeStruct((rows, lanes), x.dtype),
        grid_spec=pl.GridSpec(
            grid=grid,
            in_specs=[pl.BlockSpec((block_rows, lanes), lambda i: (i, 0))],
            out_specs=pl.BlockSpec((block_rows, lanes), lambda i: (i, 0)),
        ),
        compiler_params=pltpu.CompilerParams(
            dimension_semantics=("parallel",),
        ),
    )(x2d)
    return out2d.reshape(x.shape)


def _reference(max_seq_len_batch, kmer):
    return max_seq_len_batch - kmer + 1 + 2


if __name__ == "__main__":
    key = jax.random.PRNGKey(0)
    KMER = 4

    # --- Kernel path: batch big enough for a multi-step, two-core-shardable grid.
    ROWS, COLS = 512, 1024  # 2 MiB int32 -> reshaped to (32, 16384), 2 grid steps
    max_seq_len = jax.random.randint(key, (ROWS, COLS), 16, 256, dtype=jnp.int32)

    out = base_encoder_max_len(max_seq_len, KMER)
    out = jax.block_until_ready(out)
    ref = _reference(max_seq_len, KMER)
    assert out.shape == (ROWS, COLS)
    assert out.dtype == jnp.int32
    assert bool(jnp.all(out == ref))

    # --- Small-input fast path (plain jnp, no pallas_call launched).
    small = max_seq_len[:4, :8]
    out_small = jax.block_until_ready(base_encoder_max_len(small, KMER))
    assert bool(jnp.all(out_small == _reference(small, KMER)))

    # --- int16 path: halves HBM bytes for large batches (kernel path forced).
    x16 = max_seq_len.astype(jnp.int16)
    out16 = jax.block_until_ready(base_encoder_max_len(x16, KMER, force_kernel=True))
    assert out16.dtype == jnp.int16
    assert bool(jnp.all(out16.astype(jnp.int32) == ref))

    # --- Explicit max_len branch: trace-time Python branch, no kernel.
    out_given = jax.block_until_ready(
        base_encoder_max_len(max_seq_len, KMER, max_len=42)
    )
    assert int(out_given) == 42

    print("KERNEL_OK")
</pallas_src>

<mosaic_0001>
module attributes {stable_mosaic.version = 11 : i64} {
  func.func @kernel(%arg0: i32, %arg1: memref<16x16384xi32, #tpu.memory_space<vmem>>, %arg2: memref<16x16384xi32, #tpu.memory_space<vmem>>) attributes {dimension_semantics = [#tpu.dimension_semantics<parallel>], iteration_bounds = array<i64: 2>, scalar_prefetch = 0 : i64, scratch_operands = 0 : i64, tpu.core_type = #tpu.core_type<tc>, window_params = [{transform_indices = @transform_0, window_bounds = array<i64: 16, 16384>}, {transform_indices = @transform_1, window_bounds = array<i64: 16, 16384>}]} {
    %c0 = arith.constant 0 : index
    %c0_0 = arith.constant 0 : index
    %0 = vector.load %arg1[%c0, %c0_0] : memref<16x16384xi32, #tpu.memory_space<vmem>>, vector<16x16384xi32>
    %c-1_i32 = arith.constant -1 : i32
    %1 = vector.broadcast %c-1_i32 : i32 to vector<16x16384xi32>
    %2 = arith.addi %0, %1 : vector<16x16384xi32>
    %c0_1 = arith.constant 0 : index
    %c0_2 = arith.constant 0 : index
    %3 = vector.load %arg2[%c0_1, %c0_2] : memref<16x16384xi32, #tpu.memory_space<vmem>>, vector<16x16384xi32>
    tpu.vector_store %arg2[%c0_1, %c0_2], %2 {strides = array<i32>} : memref<16x16384xi32, #tpu.memory_space<vmem>>, vector<16x16384xi32>,
    return
  }
  func.func @transform_0(%arg0: i32) -> (i32, i32) {
    %c0_i32 = arith.constant 0 : i32
    %c0_i32_0 = arith.constant 0 : i32
    return %arg0, %c0_i32 : i32, i32
  }
  func.func @transform_1(%arg0: i32) -> (i32, i32) {
    %c0_i32 = arith.constant 0 : i32
    %c0_i32_0 = arith.constant 0 : i32
    return %arg0, %c0_i32 : i32, i32
  }
}

</mosaic_0001>

<bundles_post_ra>
// kernel: tpu_custom_call.1
= control target key start
LH: loop header
LB: loop body
LE: loop exit
PB: predicated region body
PF: predicated region fallthrough
CT: control target
= control target key end

     0   :  { %6 = vsyncpa [#allocation3], 0  ;;  %s1861_s0 = inlined_call_operand.hbm [shape: s32[32,16384], index: 0, kind: input, shape index: {}]   ;;  %s1862_s1 = inlined_call_operand.hbm [shape: s32[32,16384], index: 1, kind: output, shape index: {}]  }
   0x1   :  { %8 = vsyncpa [#allocation3 + $0x1], 0 }
   0x2   :  { %9 = vsyncpa [#allocation4], 0 }
   0x3   :  { %11 = vsyncpa [#allocation4 + $0x1], 0  ;;  %s1178_s6 = smov 0   ;;  %s1180_s7 = smov 0  }
   0x4   :  { %s1182_s8 = smov 0   ;;  %s1184_s9 = smov 0  }
   0x5 LB: > { %s1199_s10 = sadd.s32 4294967295, %s1160_s9   ;;  %s994_s11 = sadd.s32 4294967294, %s1160_s9   ;;  %s1160_s9 = sphi %s1184_s9, %s1875_s9   ;;  %s1156_s8 = sphi %s1182_s8, %s1874_s8   ;;  %s1152_s7 = sphi %s1180_s7, %s1873_s7   ;;  %s1148_s6 = sphi %s1178_s6, %s1872_s6  }
   0x6   : > { %s1203_s12 = sadd.s32 1, %s1160_s9   ;;  %s24_s13 = sadd.s32 1, %s1156_s8 }
   0x7   : > { %s21_s14 = ssub.s32 %s1160_s9, %s1203_s12  ;;  %p31_p0 = scmp.ne.s32.totalorder %s1156_s8, %s1152_s7 }
   0x8   : > { %p22_p1 = scmp.eq.s32.totalorder %s21_s14, 0  ;;  %p32_p2 = scmp.eq.s32.totalorder %s1160_s9, 0 }
   0x9   : > { %p37_p3 = scmp.ne.s32.totalorder %s1152_s7, %s1148_s6  ;;  %p38_p4 = scmp.eq.s32.totalorder %s1199_s10, 0 }
   0xa   : > { %s1215_s15 = scalar_select %p22_p1, %s1156_s8, %s24_s13  }
   0xb   : > { %p1217_p5 = por %p32_p2, %p31_p0  ;;  %p1221_p6 = por %p38_p4, %p37_p3 }
   0xc   : > { %p61_p7 = scmp.eq.s32.totalorder %s1199_s10, 1  ;;  %p67_p8 = scmp.eq.s32.totalorder %s994_s11, 1 }
   0xd   : > { %p1026_p10 = scmp.lt.s32.totalorder %s1160_s9, 2  ;;  %s87_s20 = sand.u32 1, %s1156_s8  }
   0xe   : > { %p1228_p11 = por %p61_p7, %p31_p0  ;;  %p1232_p12 = por %p67_p8, %p37_p3 }
   0xf   : > { %s1011_s21 = sshll.u32 %s1160_s9, 15  ;;  %s997_s22 = sshll.u32 %s87_s20, 11 }
  0x10   : > { %s1866_s18 = scalar_select %p1228_p11, 1, 0 }
  0x11   : > { %s1867_s19 = scalar_select %p1232_p12, 1, 0 }
  0x12   : > { %s1241_s25 = scalar_lea.hbm %s1861_s0, %s1011_s21  ;;  %s91_s26 = scalar_lea.vmem [#allocation2], %s997_s22 }
  0x13   : > { %s99_s27 = sshll.u32 %s91_s26, 4  ;;  %p1245_p13 = pnand %p1026_p10, %p1217_p5  ;;  %s1249_s27 = int_to_ptr.vmem [resolvable:$true] %s99_s27 }
  0x14   : > { %s1251_s29 = scalar_lea.sflag [#allocation3], %s87_s20  ;;  %s1064_s30 = scalar_lea.hbm %s1241_s25, 32768 }
  0x15   : > { %p1065_p0 = scmp.ne.s32.totalorder %s1241_s25, %s1064_s30  ;;  %p1066_p1 = pneg %p1245_p13 }
  0x16   : > { %s1069_s4 = scalar_lea.hbm %s1861_s0, 65536  ;;  %p1070_p4 = scmp.lt.u32.totalorder %s1241_s25, %s1861_s0 }
  0x17   : > { %p1067_p2 = pnand %p1066_p1, %p1065_p0  ;;  %p1071_p5 = scmp.lt.u32.totalorder %s1069_s4, %s1064_s30 }
  0x18   : > { %p1073_p8 = scmp.lt.u32.totalorder %s1064_s30, %s1241_s25 }
  0x19   : > { %p1068_p3 = pneg %p1067_p2  ;;  %p1072_p7 = por %p1071_p5, %p1070_p4 }
  0x1b   : > { %p1074_p10 = por %p1073_p8, %p1072_p7 }
  0x1d   : > { %p1075_p9 = pnand %p1074_p10, %p1068_p3 }
  0x1f   : > { %1078 = shalt.err (!%p1075_p9)
}
  0x20   : > { %s1079_s13 = scalar_lea.vmem %s1249_s27, 32768  ;;  %s1162_s14 = smov [#allocation2]  }
  0x21   : > { %p1080_p0 = scmp.ne.s32.totalorder %s1249_s27, %s1079_s13  ;;  %s1084_s16 = sshll.u32 %s1162_s14, 4  ;;  %s1085_s16 = int_to_ptr.vmem [resolvable:$false] %s1084_s16 }
  0x22   : > { %s1086_s20 = scalar_lea.vmem %s1085_s16, 65536  ;;  %p1087_p11 = scmp.lt.s32.totalorder %s1249_s27, %s1085_s16 }
  0x23   : > { %p1082_p2 = pnand %p1080_p0, %p1066_p1  ;;  %p1088_p4 = scmp.lt.s32.totalorder %s1086_s20, %s1079_s13 }
  0x25   : > { %p1083_p12 = pneg %p1082_p2  ;;  %p1089_p5 = por %p1088_p4, %p1087_p11 }
  0x27   : > { %p1090_p7 = pnand %p1089_p5, %p1083_p12 }
  0x29   : > { %1093 = shalt.err (!%p1090_p7)
}
  0x2a   : > { %s1163_s21 = smov 16384   ;;  %s1164_s22 = smov 1024  }
  0x2b   : > { %1021 = dma.hbm_to_vmem [thread:$0]  (!%p1245_p13), %s1241_s25, 32768, %s1249_s27, %s1251_s29, %s1163_s21, %s1163_s21, %s1164_s22  }
  0x2c   : > { %p1001_p9 = scmp.ge.s32.totalorder %s1160_s9, 1  ;;  %p107_p1 = scmp.lt.s32.totalorder %s1160_s9, 3 }
  0x2e   : > { %p108_p3 = pnand %p1001_p9, %p107_p1 }
  0x2f   : > { %s1282_s23 = sand.u32 (!%p108_p3), 1, %s1152_s7  }
  0x30   : > { %111 = sbr.rel (%p108_p3) target bundleno = 208 (0xd0), region = 24  ;;  %s1002_s24 = sshll.u32 (!%p108_p3), %s1282_s23, 11 }
  0x31   : > { %s114_s26 = scalar_lea.sflag (!%p108_p3), [#allocation3], %s1282_s23  ;;  %s1286_s30 = scalar_lea.vmem (!%p108_p3), [#allocation2], %s1002_s24 }
  0x37   : > { %1139 = dma.done.wait (%p1221_p6), %s114_s26, 32768  }
  0x38   : > { %1141 = vsyncadd (%p1221_p6), %s114_s26, 4294934528  ;;  %v138_v0 = vld [vmem:[%s1286_s30] sm:$0xff]  ;;  %v139_v1 = vld [vmem:[%s1286_s30 + $0x8] sm:$0xff]  ;;  %s1013_s25 = sshll.u32 %s1199_s10, 15  ;;  %s1296_s27 = scalar_lea.vmem [#allocation5], %s1002_s24 }
  0x39   : > { %v140_v2 = vld [vmem:[%s1286_s30 + $0x10] sm:$0xff]  ;;  %s921_s17 = sshll.u32 %s1296_s27, 4  ;;  %v394_v3 = vadd.s32 4294967295, %v138_v0  ;;  %v395_v4 = vadd.s32 4294967295, %v139_v1  ;;  %v141_v6 = vld [vmem:[%s1286_s30 + $0x18] sm:$0xff]  ;;  %v142_v7 = vld [vmem:[%s1286_s30 + $0x20] sm:$0xff]  ;;  %s1806_s2 = scalar_lea.hbm %s1862_s1, %s1013_s25  ;;  %s1810_s17 = int_to_ptr.vmem [resolvable:$true] %s921_s17 }
  0x3a   : > { %v396_v5 = vadd.s32 4294967295, %v140_v2  ;;  %v143_v8 = vld [vmem:[%s1286_s30 + $0x28] sm:$0xff]  ;;  %v397_v9 = vadd.s32 4294967295, %v141_v6  ;;  %v398_v10 = vadd.s32 4294967295, %v142_v7  ;;  %v144_v12 = vld [vmem:[%s1286_s30 + $0x30] sm:$0xff]  ;;  %v145_v13 = vld [vmem:[%s1286_s30 + $0x38] sm:$0xff] }
  0x3b   : > { %v399_v11 = vadd.s32 4294967295, %v143_v8  ;;  %v146_v14 = vld [vmem:[%s1286_s30 + $0x40] sm:$0xff]  ;;  %650 = vst [vmem:[%s1296_s27] sm:$0xff] %v394_v3  ;;  %651 = vst [vmem:[%s1296_s27 + $0x8] sm:$0xff] %v395_v4  ;;  %v400_v15 = vadd.s32 4294967295, %v144_v12  ;;  %v401_v16 = vadd.s32 4294967295, %v145_v13  ;;  %v147_v18 = vld [vmem:[%s1286_s30 + $0x48] sm:$0xff] }
  0x3c   : > { %652 = vst [vmem:[%s1296_s27 + $0x10] sm:$0xff] %v396_v5  ;;  %v402_v17 = vadd.s32 4294967295, %v146_v14  ;;  %v148_v19 = vld [vmem:[%s1286_s30 + $0x50] sm:$0xff]  ;;  %v149_v20 = vld [vmem:[%s1286_s30 + $0x58] sm:$0xff]  ;;  %653 = vst [vmem:[%s1296_s27 + $0x18] sm:$0xff] %v397_v9  ;;  %v403_v21 = vadd.s32 4294967295, %v147_v18 }
  0x3d   : > { %654 = vst [vmem:[%s1296_s27 + $0x20] sm:$0xff] %v398_v10  ;;  %655 = vst [vmem:[%s1296_s27 + $0x28] sm:$0xff] %v399_v11  ;;  %v404_v22 = vadd.s32 4294967295, %v148_v19  ;;  %v405_v23 = vadd.s32 4294967295, %v149_v20  ;;  %v150_v24 = vld [vmem:[%s1286_s30 + $0x60] sm:$0xff]  ;;  %v151_v25 = vld [vmem:[%s1286_s30 + $0x68] sm:$0xff] }
  0x3e   : > { %v152_v26 = vld [vmem:[%s1286_s30 + $0x70] sm:$0xff]  ;;  %656 = vst [vmem:[%s1296_s27 + $0x30] sm:$0xff] %v400_v15  ;;  %657 = vst [vmem:[%s1296_s27 + $0x38] sm:$0xff] %v401_v16  ;;  %v406_v27 = vadd.s32 4294967295, %v150_v24  ;;  %v407_v28 = vadd.s32 4294967295, %v151_v25  ;;  %v153_v30 = vld [vmem:[%s1286_s30 + $0x78] sm:$0xff] }
  0x3f   : > { %658 = vst [vmem:[%s1296_s27 + $0x40] sm:$0xff] %v402_v17  ;;  %v408_v29 = vadd.s32 4294967295, %v152_v26  ;;  %v154_v31 = vld [vmem:[%s1286_s30 + $0x80] sm:$0xff]  ;;  %v155_v32 = vld [vmem:[%s1286_s30 + $0x88] sm:$0xff]  ;;  %659 = vst [vmem:[%s1296_s27 + $0x48] sm:$0xff] %v403_v21  ;;  %v409_v33 = vadd.s32 4294967295, %v153_v30 }
  0x40   : > { %660 = vst [vmem:[%s1296_s27 + $0x50] sm:$0xff] %v404_v22  ;;  %661 = vst [vmem:[%s1296_s27 + $0x58] sm:$0xff] %v405_v23  ;;  %v410_v34 = vadd.s32 4294967295, %v154_v31  ;;  %v411_v35 = vadd.s32 4294967295, %v155_v32  ;;  %v156_v36 = vld [vmem:[%s1286_s30 + $0x90] sm:$0xff]  ;;  %v157_v37 = vld [vmem:[%s1286_s30 + $0x98] sm:$0xff] }
  0x41   : > { %v158_v38 = vld [vmem:[%s1286_s30 + $0xa0] sm:$0xff]  ;;  %662 = vst [vmem:[%s1296_s27 + $0x60] sm:$0xff] %v406_v27  ;;  %663 = vst [vmem:[%s1296_s27 + $0x68] sm:$0xff] %v407_v28  ;;  %v412_v39 = vadd.s32 4294967295, %v156_v36  ;;  %v413_v40 = vadd.s32 4294967295, %v157_v37  ;;  %v159_v42 = vld [vmem:[%s1286_s30 + $0xa8] sm:$0xff] }
  0x42   : > { %664 = vst [vmem:[%s1296_s27 + $0x70] sm:$0xff] %v408_v29  ;;  %v414_v41 = vadd.s32 4294967295, %v158_v38  ;;  %v160_v43 = vld [vmem:[%s1286_s30 + $0xb0] sm:$0xff]  ;;  %v161_v44 = vld [vmem:[%s1286_s30 + $0xb8] sm:$0xff]  ;;  %665 = vst [vmem:[%s1296_s27 + $0x78] sm:$0xff] %v409_v33  ;;  %v415_v45 = vadd.s32 4294967295, %v159_v42 }
  0x43   : > { %666 = vst [vmem:[%s1296_s27 + $0x80] sm:$0xff] %v410_v34  ;;  %667 = vst [vmem:[%s1296_s27 + $0x88] sm:$0xff] %v411_v35  ;;  %v416_v46 = vadd.s32 4294967295, %v160_v43  ;;  %v417_v47 = vadd.s32 4294967295, %v161_v44  ;;  %v162_v48 = vld [vmem:[%s1286_s30 + $0xc0] sm:$0xff]  ;;  %v163_v49 = vld [vmem:[%s1286_s30 + $0xc8] sm:$0xff] }
  0x44   : > { %v164_v50 = vld [vmem:[%s1286_s30 + $0xd0] sm:$0xff]  ;;  %668 = vst [vmem:[%s1296_s27 + $0x90] sm:$0xff] %v412_v39  ;;  %669 = vst [vmem:[%s1296_s27 + $0x98] sm:$0xff] %v413_v40  ;;  %v418_v51 = vadd.s32 4294967295, %v162_v48  ;;  %v419_v52 = vadd.s32 4294967295, %v163_v49  ;;  %v165_v54 = vld [vmem:[%s1286_s30 + $0xd8] sm:$0xff] }
  0x45   : > { %670 = vst [vmem:[%s1296_s27 + $0xa0] sm:$0xff] %v414_v41  ;;  %v420_v53 = vadd.s32 4294967295, %v164_v50  ;;  %v166_v55 = vld [vmem:[%s1286_s30 + $0xe0] sm:$0xff]  ;;  %v167_v56 = vld [vmem:[%s1286_s30 + $0xe8] sm:$0xff]  ;;  %671 = vst [vmem:[%s1296_s27 + $0xa8] sm:$0xff] %v415_v45  ;;  %v421_v57 = vadd.s32 4294967295, %v165_v54 }
  0x46   : > { %672 = vst [vmem:[%s1296_s27 + $0xb0] sm:$0xff] %v416_v46  ;;  %673 = vst [vmem:[%s1296_s27 + $0xb8] sm:$0xff] %v417_v47  ;;  %v422_v58 = vadd.s32 4294967295, %v166_v55  ;;  %v423_v59 = vadd.s32 4294967295, %v167_v56  ;;  %v168_v60 = vld [vmem:[%s1286_s30 + $0xf0] sm:$0xff]  ;;  %v169_v61 = vld [vmem:[%s1286_s30 + $0xf8] sm:$0xff] }
  0x47   : > { %v170_v62 = vld [vmem:[%s1286_s30 + $0x100] sm:$0xff]  ;;  %674 = vst [vmem:[%s1296_s27 + $0xc0] sm:$0xff] %v418_v51  ;;  %675 = vst [vmem:[%s1296_s27 + $0xc8] sm:$0xff] %v419_v52  ;;  %v424_v63 = vadd.s32 4294967295, %v168_v60  ;;  %v425_v0 = vadd.s32 4294967295, %v169_v61  ;;  %v171_v2 = vld [vmem:[%s1286_s30 + $0x108] sm:$0xff] }
  0x48   : > { %676 = vst [vmem:[%s1296_s27 + $0xd0] sm:$0xff] %v420_v53  ;;  %v426_v1 = vadd.s32 4294967295, %v170_v62  ;;  %v172_v3 = vld [vmem:[%s1286_s30 + $0x110] sm:$0xff]  ;;  %v173_v4 = vld [vmem:[%s1286_s30 + $0x118] sm:$0xff]  ;;  %677 = vst [vmem:[%s1296_s27 + $0xd8] sm:$0xff] %v421_v57  ;;  %v427_v5 = vadd.s32 4294967295, %v171_v2 }
  0x49   : > { %678 = vst [vmem:[%s1296_s27 + $0xe0] sm:$0xff] %v422_v58  ;;  %679 = vst [vmem:[%s1296_s27 + $0xe8] sm:$0xff] %v423_v59  ;;  %v428_v6 = vadd.s32 4294967295, %v172_v3  ;;  %v429_v7 = vadd.s32 4294967295, %v173_v4  ;;  %v174_v8 = vld [vmem:[%s1286_s30 + $0x120] sm:$0xff]  ;;  %v175_v9 = vld [vmem:[%s1286_s30 + $0x128] sm:$0xff] }
  0x4a   : > { %v176_v10 = vld [vmem:[%s1286_s30 + $0x130] sm:$0xff]  ;;  %680 = vst [vmem:[%s1296_s27 + $0xf0] sm:$0xff] %v424_v63  ;;  %681 = vst [vmem:[%s1296_s27 + $0xf8] sm:$0xff] %v425_v0  ;;  %v430_v11 = vadd.s32 4294967295, %v174_v8  ;;  %v431_v12 = vadd.s32 4294967295, %v175_v9  ;;  %v177_v14 = vld [vmem:[%s1286_s30 + $0x138] sm:$0xff] }
  0x4b   : > { %682 = vst [vmem:[%s1296_s27 + $0x100] sm:$0xff] %v426_v1  ;;  %v432_v13 = vadd.s32 4294967295, %v176_v10  ;;  %v178_v15 = vld [vmem:[%s1286_s30 + $0x140] sm:$0xff]  ;;  %v179_v16 = vld [vmem:[%s1286_s30 + $0x148] sm:$0xff]  ;;  %683 = vst [vmem:[%s1296_s27 + $0x108] sm:$0xff] %v427_v5  ;;  %v433_v17 = vadd.s32 4294967295, %v177_v14 }
  0x4c   : > { %684 = vst [vmem:[%s1296_s27 + $0x110] sm:$0xff] %v428_v6  ;;  %685 = vst [vmem:[%s1296_s27 + $0x118] sm:$0xff] %v429_v7  ;;  %v434_v18 = vadd.s32 4294967295, %v178_v15  ;;  %v435_v19 = vadd.s32 4294967295, %v179_v16  ;;  %v180_v20 = vld [vmem:[%s1286_s30 + $0x150] sm:$0xff]  ;;  %v181_v21 = vld [vmem:[%s1286_s30 + $0x158] sm:$0xff] }
  0x4d   : > { %v182_v22 = vld [vmem:[%s1286_s30 + $0x160] sm:$0xff]  ;;  %686 = vst [vmem:[%s1296_s27 + $0x120] sm:$0xff] %v430_v11  ;;  %687 = vst [vmem:[%s1296_s27 + $0x128] sm:$0xff] %v431_v12  ;;  %v436_v23 = vadd.s32 4294967295, %v180_v20  ;;  %v437_v24 = vadd.s32 4294967295, %v181_v21  ;;  %v183_v26 = vld [vmem:[%s1286_s30 + $0x168] sm:$0xff] }
  0x4e   : > { %688 = vst [vmem:[%s1296_s27 + $0x130] sm:$0xff] %v432_v13  ;;  %v438_v25 = vadd.s32 4294967295, %v182_v22  ;;  %v184_v27 = vld [vmem:[%s1286_s30 + $0x170] sm:$0xff]  ;;  %v185_v28 = vld [vmem:[%s1286_s30 + $0x178] sm:$0xff]  ;;  %689 = vst [vmem:[%s1296_s27 + $0x138] sm:$0xff] %v433_v17  ;;  %v439_v29 = vadd.s32 4294967295, %v183_v26 }
  0x4f   : > { %690 = vst [vmem:[%s1296_s27 + $0x140] sm:$0xff] %v434_v18  ;;  %691 = vst [vmem:[%s1296_s27 + $0x148] sm:$0xff] %v435_v19  ;;  %v440_v30 = vadd.s32 4294967295, %v184_v27  ;;  %v441_v31 = vadd.s32 4294967295, %v185_v28  ;;  %v186_v32 = vld [vmem:[%s1286_s30 + $0x180] sm:$0xff]  ;;  %v187_v33 = vld [vmem:[%s1286_s30 + $0x188] sm:$0xff] }
  0x50   : > { %v188_v34 = vld [vmem:[%s1286_s30 + $0x190] sm:$0xff]  ;;  %692 = vst [vmem:[%s1296_s27 + $0x150] sm:$0xff] %v436_v23  ;;  %693 = vst [vmem:[%s1296_s27 + $0x158] sm:$0xff] %v437_v24  ;;  %v442_v35 = vadd.s32 4294967295, %v186_v32  ;;  %v443_v36 = vadd.s32 4294967295, %v187_v33  ;;  %v189_v38 = vld [vmem:[%s1286_s30 + $0x198] sm:$0xff] }
  0x51   : > { %694 = vst [vmem:[%s1296_s27 + $0x160] sm:$0xff] %v438_v25  ;;  %v444_v37 = vadd.s32 4294967295, %v188_v34  ;;  %v190_v39 = vld [vmem:[%s1286_s30 + $0x1a0] sm:$0xff]  ;;  %v191_v40 = vld [vmem:[%s1286_s30 + $0x1a8] sm:$0xff]  ;;  %695 = vst [vmem:[%s1296_s27 + $0x168] sm:$0xff] %v439_v29  ;;  %v445_v41 = vadd.s32 4294967295, %v189_v38 }
  0x52   : > { %696 = vst [vmem:[%s1296_s27 + $0x170] sm:$0xff] %v440_v30  ;;  %697 = vst [vmem:[%s1296_s27 + $0x178] sm:$0xff] %v441_v31  ;;  %v446_v42 = vadd.s32 4294967295, %v190_v39  ;;  %v447_v43 = vadd.s32 4294967295, %v191_v40  ;;  %v192_v44 = vld [vmem:[%s1286_s30 + $0x1b0] sm:$0xff]  ;;  %v193_v45 = vld [vmem:[%s1286_s30 + $0x1b8] sm:$0xff] }
  0x53   : > { %v194_v46 = vld [vmem:[%s1286_s30 + $0x1c0] sm:$0xff]  ;;  %698 = vst [vmem:[%s1296_s27 + $0x180] sm:$0xff] %v442_v35  ;;  %699 = vst [vmem:[%s1296_s27 + $0x188] sm:$0xff] %v443_v36  ;;  %v448_v47 = vadd.s32 4294967295, %v192_v44  ;;  %v449_v48 = vadd.s32 4294967295, %v193_v45  ;;  %v195_v50 = vld [vmem:[%s1286_s30 + $0x1c8] sm:$0xff] }
  0x54   : > { %700 = vst [vmem:[%s1296_s27 + $0x190] sm:$0xff] %v444_v37  ;;  %v450_v49 = vadd.s32 4294967295, %v194_v46  ;;  %v196_v51 = vld [vmem:[%s1286_s30 + $0x1d0] sm:$0xff]  ;;  %v197_v52 = vld [vmem:[%s1286_s30 + $0x1d8] sm:$0xff]  ;;  %701 = vst [vmem:[%s1296_s27 + $0x198] sm:$0xff] %v445_v41  ;;  %v451_v53 = vadd.s32 4294967295, %v195_v50 }
  0x55   : > { %702 = vst [vmem:[%s1296_s27 + $0x1a0] sm:$0xff] %v446_v42  ;;  %703 = vst [vmem:[%s1296_s27 + $0x1a8] sm:$0xff] %v447_v43  ;;  %v452_v54 = vadd.s32 4294967295, %v196_v51  ;;  %v453_v55 = vadd.s32 4294967295, %v197_v52  ;;  %v198_v56 = vld [vmem:[%s1286_s30 + $0x1e0] sm:$0xff]  ;;  %v199_v57 = vld [vmem:[%s1286_s30 + $0x1e8] sm:$0xff] }
  0x56   : > { %v200_v58 = vld [vmem:[%s1286_s30 + $0x1f0] sm:$0xff]  ;;  %704 = vst [vmem:[%s1296_s27 + $0x1b0] sm:$0xff] %v448_v47  ;;  %705 = vst [vmem:[%s1296_s27 + $0x1b8] sm:$0xff] %v449_v48  ;;  %v454_v59 = vadd.s32 4294967295, %v198_v56  ;;  %v455_v60 = vadd.s32 4294967295, %v199_v57  ;;  %v201_v62 = vld [vmem:[%s1286_s30 + $0x1f8] sm:$0xff] }
  0x57   : > { %706 = vst [vmem:[%s1296_s27 + $0x1c0] sm:$0xff] %v450_v49  ;;  %v456_v61 = vadd.s32 4294967295, %v200_v58  ;;  %v202_v63 = vld [vmem:[%s1286_s30 + $0x200] sm:$0xff]  ;;  %v203_v0 = vld [vmem:[%s1286_s30 + $0x208] sm:$0xff]  ;;  %707 = vst [vmem:[%s1296_s27 + $0x1c8] sm:$0xff] %v451_v53  ;;  %v457_v1 = vadd.s32 4294967295, %v201_v62 }
  0x58   : > { %708 = vst [vmem:[%s1296_s27 + $0x1d0] sm:$0xff] %v452_v54  ;;  %709 = vst [vmem:[%s1296_s27 + $0x1d8] sm:$0xff] %v453_v55  ;;  %v458_v2 = vadd.s32 4294967295, %v202_v63  ;;  %v459_v3 = vadd.s32 4294967295, %v203_v0  ;;  %v204_v4 = vld [vmem:[%s1286_s30 + $0x210] sm:$0xff]  ;;  %v205_v5 = vld [vmem:[%s1286_s30 + $0x218] sm:$0xff] }
  0x59   : > { %v206_v6 = vld [vmem:[%s1286_s30 + $0x220] sm:$0xff]  ;;  %710 = vst [vmem:[%s1296_s27 + $0x1e0] sm:$0xff] %v454_v59  ;;  %711 = vst [vmem:[%s1296_s27 + $0x1e8] sm:$0xff] %v455_v60  ;;  %v460_v7 = vadd.s32 4294967295, %v204_v4  ;;  %v461_v8 = vadd.s32 4294967295, %v205_v5  ;;  %v207_v10 = vld [vmem:[%s1286_s30 + $0x228] sm:$0xff] }
  0x5a   : > { %712 = vst [vmem:[%s1296_s27 + $0x1f0] sm:$0xff] %v456_v61  ;;  %v462_v9 = vadd.s32 4294967295, %v206_v6  ;;  %v208_v11 = vld [vmem:[%s1286_s30 + $0x230] sm:$0xff]  ;;  %v209_v12 = vld [vmem:[%s1286_s30 + $0x238] sm:$0xff]  ;;  %713 = vst [vmem:[%s1296_s27 + $0x1f8] sm:$0xff] %v457_v1  ;;  %v463_v13 = vadd.s32 4294967295, %v207_v10 }
  0x5b   : > { %714 = vst [vmem:[%s1296_s27 + $0x200] sm:$0xff] %v458_v2  ;;  %715 = vst [vmem:[%s1296_s27 + $0x208] sm:$0xff] %v459_v3  ;;  %v464_v14 = vadd.s32 4294967295, %v208_v11  ;;  %v465_v15 = vadd.s32 4294967295, %v209_v12  ;;  %v210_v16 = vld [vmem:[%s1286_s30 + $0x240] sm:$0xff]  ;;  %v211_v17 = vld [vmem:[%s1286_s30 + $0x248] sm:$0xff] }
  0x5c   : > { %v212_v18 = vld [vmem:[%s1286_s30 + $0x250] sm:$0xff]  ;;  %716 = vst [vmem:[%s1296_s27 + $0x210] sm:$0xff] %v460_v7  ;;  %717 = vst [vmem:[%s1296_s27 + $0x218] sm:$0xff] %v461_v8  ;;  %v466_v19 = vadd.s32 4294967295, %v210_v16  ;;  %v467_v20 = vadd.s32 4294967295, %v211_v17  ;;  %v213_v22 = vld [vmem:[%s1286_s30 + $0x258] sm:$0xff] }
  0x5d   : > { %718 = vst [vmem:[%s1296_s27 + $0x220] sm:$0xff] %v462_v9  ;;  %v468_v21 = vadd.s32 4294967295, %v212_v18  ;;  %v214_v23 = vld [vmem:[%s1286_s30 + $0x260] sm:$0xff]  ;;  %v215_v24 = vld [vmem:[%s1286_s30 + $0x268] sm:$0xff]  ;;  %719 = vst [vmem:[%s1296_s27 + $0x228] sm:$0xff] %v463_v13  ;;  %v469_v25 = vadd.s32 4294967295, %v213_v22 }
  0x5e   : > { %720 = vst [vmem:[%s1296_s27 + $0x230] sm:$0xff] %v464_v14  ;;  %721 = vst [vmem:[%s1296_s27 + $0x238] sm:$0xff] %v465_v15  ;;  %v470_v26 = vadd.s32 4294967295, %v214_v23  ;;  %v471_v27 = vadd.s32 4294967295, %v215_v24  ;;  %v216_v28 = vld [vmem:[%s1286_s30 + $0x270] sm:$0xff]  ;;  %v217_v29 = vld [vmem:[%s1286_s30 + $0x278] sm:$0xff] }
  0x5f   : > { %v218_v30 = vld [vmem:[%s1286_s30 + $0x280] sm:$0xff]  ;;  %722 = vst [vmem:[%s1296_s27 + $0x240] sm:$0xff] %v466_v19  ;;  %723 = vst [vmem:[%s1296_s27 + $0x248] sm:$0xff] %v467_v20  ;;  %v472_v31 = vadd.s32 4294967295, %v216_v28  ;;  %v473_v32 = vadd.s32 4294967295, %v217_v29  ;;  %v219_v34 = vld [vmem:[%s1286_s30 + $0x288] sm:$0xff] }
  0x60   : > { %724 = vst [vmem:[%s1296_s27 + $0x250] sm:$0xff] %v468_v21  ;;  %v474_v33 = vadd.s32 4294967295, %v218_v30  ;;  %v220_v35 = vld [vmem:[%s1286_s30 + $0x290] sm:$0xff]  ;;  %v221_v36 = vld [vmem:[%s1286_s30 + $0x298] sm:$0xff]  ;;  %725 = vst [vmem:[%s1296_s27 + $0x258] sm:$0xff] %v469_v25  ;;  %v475_v37 = vadd.s32 4294967295, %v219_v34 }
  0x61   : > { %726 = vst [vmem:[%s1296_s27 + $0x260] sm:$0xff] %v470_v26  ;;  %727 = vst [vmem:[%s1296_s27 + $0x268] sm:$0xff] %v471_v27  ;;  %v476_v38 = vadd.s32 4294967295, %v220_v35  ;;  %v477_v39 = vadd.s32 4294967295, %v221_v36  ;;  %v222_v40 = vld [vmem:[%s1286_s30 + $0x2a0] sm:$0xff]  ;;  %v223_v41 = vld [vmem:[%s1286_s30 + $0x2a8] sm:$0xff] }
  0x62   : > { %v224_v42 = vld [vmem:[%s1286_s30 + $0x2b0] sm:$0xff]  ;;  %728 = vst [vmem:[%s1296_s27 + $0x270] sm:$0xff] %v472_v31  ;;  %729 = vst [vmem:[%s1296_s27 + $0x278] sm:$0xff] %v473_v32  ;;  %v478_v43 = vadd.s32 4294967295, %v222_v40  ;;  %v479_v44 = vadd.s32 4294967295, %v223_v41  ;;  %v225_v46 = vld [vmem:[%s1286_s30 + $0x2b8] sm:$0xff] }
  0x63   : > { %730 = vst [vmem:[%s1296_s27 + $0x280] sm:$0xff] %v474_v33  ;;  %v480_v45 = vadd.s32 4294967295, %v224_v42  ;;  %v226_v47 = vld [vmem:[%s1286_s30 + $0x2c0] sm:$0xff]  ;;  %v227_v48 = vld [vmem:[%s1286_s30 + $0x2c8] sm:$0xff]  ;;  %731 = vst [vmem:[%s1296_s27 + $0x288] sm:$0xff] %v475_v37  ;;  %v481_v49 = vadd.s32 4294967295, %v225_v46 }
  0x64   : > { %732 = vst [vmem:[%s1296_s27 + $0x290] sm:$0xff] %v476_v38  ;;  %733 = vst [vmem:[%s1296_s27 + $0x298] sm:$0xff] %v477_v39  ;;  %v482_v50 = vadd.s32 4294967295, %v226_v47  ;;  %v483_v51 = vadd.s32 4294967295, %v227_v48  ;;  %v228_v52 = vld [vmem:[%s1286_s30 + $0x2d0] sm:$0xff]  ;;  %v229_v53 = vld [vmem:[%s1286_s30 + $0x2d8] sm:$0xff] }
  0x65   : > { %v230_v54 = vld [vmem:[%s1286_s30 + $0x2e0] sm:$0xff]  ;;  %734 = vst [vmem:[%s1296_s27 + $0x2a0] sm:$0xff] %v478_v43  ;;  %735 = vst [vmem:[%s1296_s27 + $0x2a8] sm:$0xff] %v479_v44  ;;  %v484_v55 = vadd.s32 4294967295, %v228_v52  ;;  %v485_v56 = vadd.s32 4294967295, %v229_v53  ;;  %v231_v58 = vld [vmem:[%s1286_s30 + $0x2e8] sm:$0xff] }
  0x66   : > { %736 = vst [vmem:[%s1296_s27 + $0x2b0] sm:$0xff] %v480_v45  ;;  %v486_v57 = vadd.s32 4294967295, %v230_v54  ;;  %v232_v59 = vld [vmem:[%s1286_s30 + $0x2f0] sm:$0xff]  ;;  %v233_v60 = vld [vmem:[%s1286_s30 + $0x2f8] sm:$0xff]  ;;  %737 = vst [vmem:[%s1296_s27 + $0x2b8] sm:$0xff] %v481_v49  ;;  %v487_v61 = vadd.s32 4294967295, %v231_v58 }
  0x67   : > { %738 = vst [vmem:[%s1296_s27 + $0x2c0] sm:$0xff] %v482_v50  ;;  %739 = vst [vmem:[%s1296_s27 + $0x2c8] sm:$0xff] %v483_v51  ;;  %v488_v62 = vadd.s32 4294967295, %v232_v59  ;;  %v489_v63 = vadd.s32 4294967295, %v233_v60  ;;  %v234_v0 = vld [vmem:[%s1286_s30 + $0x300] sm:$0xff]  ;;  %v235_v1 = vld [vmem:[%s1286_s30 + $0x308] sm:$0xff] }
  0x68   : > { %v236_v2 = vld [vmem:[%s1286_s30 + $0x310] sm:$0xff]  ;;  %740 = vst [vmem:[%s1296_s27 + $0x2d0] sm:$0xff] %v484_v55  ;;  %741 = vst [vmem:[%s1296_s27 + $0x2d8] sm:$0xff] %v485_v56  ;;  %v490_v3 = vadd.s32 4294967295, %v234_v0  ;;  %v491_v4 = vadd.s32 4294967295, %v235_v1  ;;  %v237_v6 = vld [vmem:[%s1286_s30 + $0x318] sm:$0xff] }
  0x69   : > { %742 = vst [vmem:[%s1296_s27 + $0x2e0] sm:$0xff] %v486_v57  ;;  %v492_v5 = vadd.s32 4294967295, %v236_v2  ;;  %v238_v7 = vld [vmem:[%s1286_s30 + $0x320] sm:$0xff]  ;;  %v239_v8 = vld [vmem:[%s1286_s30 + $0x328] sm:$0xff]  ;;  %743 = vst [vmem:[%s1296_s27 + $0x2e8] sm:$0xff] %v487_v61  ;;  %v493_v9 = vadd.s32 4294967295, %v237_v6 }
  0x6a   : > { %744 = vst [vmem:[%s1296_s27 + $0x2f0] sm:$0xff] %v488_v62  ;;  %745 = vst [vmem:[%s1296_s27 + $0x2f8] sm:$0xff] %v489_v63  ;;  %v494_v10 = vadd.s32 4294967295, %v238_v7  ;;  %v495_v11 = vadd.s32 4294967295, %v239_v8  ;;  %v240_v12 = vld [vmem:[%s1286_s30 + $0x330] sm:$0xff]  ;;  %v241_v13 = vld [vmem:[%s1286_s30 + $0x338] sm:$0xff] }
  0x6b   : > { %v242_v14 = vld [vmem:[%s1286_s30 + $0x340] sm:$0xff]  ;;  %746 = vst [vmem:[%s1296_s27 + $0x300] sm:$0xff] %v490_v3  ;;  %747 = vst [vmem:[%s1296_s27 + $0x308] sm:$0xff] %v491_v4  ;;  %v496_v15 = vadd.s32 4294967295, %v240_v12  ;;  %v497_v16 = vadd.s32 4294967295, %v241_v13  ;;  %v243_v18 = vld [vmem:[%s1286_s30 + $0x348] sm:$0xff] }
  0x6c   : > { %748 = vst [vmem:[%s1296_s27 + $0x310] sm:$0xff] %v492_v5  ;;  %v498_v17 = vadd.s32 4294967295, %v242_v14  ;;  %v244_v19 = vld [vmem:[%s1286_s30 + $0x350] sm:$0xff]  ;;  %v245_v20 = vld [vmem:[%s1286_s30 + $0x358] sm:$0xff]  ;;  %749 = vst [vmem:[%s1296_s27 + $0x318] sm:$0xff] %v493_v9  ;;  %v499_v21 = vadd.s32 4294967295, %v243_v18 }
  0x6d   : > { %750 = vst [vmem:[%s1296_s27 + $0x320] sm:$0xff] %v494_v10  ;;  %751 = vst [vmem:[%s1296_s27 + $0x328] sm:$0xff] %v495_v11  ;;  %v500_v22 = vadd.s32 4294967295, %v244_v19  ;;  %v501_v23 = vadd.s32 4294967295, %v245_v20  ;;  %v246_v24 = vld [vmem:[%s1286_s30 + $0x360] sm:$0xff]  ;;  %v247_v25 = vld [vmem:[%s1286_s30 + $0x368] sm:$0xff] }
  0x6e   : > { %v248_v26 = vld [vmem:[%s1286_s30 + $0x370] sm:$0xff]  ;;  %752 = vst [vmem:[%s1296_s27 + $0x330] sm:$0xff] %v496_v15  ;;  %753 = vst [vmem:[%s1296_s27 + $0x338] sm:$0xff] %v497_v16  ;;  %v502_v27 = vadd.s32 4294967295, %v246_v24  ;;  %v503_v28 = vadd.s32 4294967295, %v247_v25  ;;  %v249_v30 = vld [vmem:[%s1286_s30 + $0x378] sm:$0xff] }
  0x6f   : > { %754 = vst [vmem:[%s1296_s27 + $0x340] sm:$0xff] %v498_v17  ;;  %v504_v29 = vadd.s32 4294967295, %v248_v26  ;;  %v250_v31 = vld [vmem:[%s1286_s30 + $0x380] sm:$0xff]  ;;  %v251_v32 = vld [vmem:[%s1286_s30 + $0x388] sm:$0xff]  ;;  %755 = vst [vmem:[%s1296_s27 + $0x348] sm:$0xff] %v499_v21  ;;  %v505_v33 = vadd.s32 4294967295, %v249_v30 }
  0x70   : > { %756 = vst [vmem:[%s1296_s27 + $0x350] sm:$0xff] %v500_v22  ;;  %757 = vst [vmem:[%s1296_s27 + $0x358] sm:$0xff] %v501_v23  ;;  %v506_v34 = vadd.s32 4294967295, %v250_v31  ;;  %v507_v35 = vadd.s32 4294967295, %v251_v32  ;;  %v252_v36 = vld [vmem:[%s1286_s30 + $0x390] sm:$0xff]  ;;  %v253_v37 = vld [vmem:[%s1286_s30 + $0x398] sm:$0xff] }
  0x71   : > { %v254_v38 = vld [vmem:[%s1286_s30 + $0x3a0] sm:$0xff]  ;;  %758 = vst [vmem:[%s1296_s27 + $0x360] sm:$0xff] %v502_v27  ;;  %759 = vst [vmem:[%s1296_s27 + $0x368] sm:$0xff] %v503_v28  ;;  %v508_v39 = vadd.s32 4294967295, %v252_v36  ;;  %v509_v40 = vadd.s32 4294967295, %v253_v37  ;;  %v255_v42 = vld [vmem:[%s1286_s30 + $0x3a8] sm:$0xff] }
  0x72   : > { %760 = vst [vmem:[%s1296_s27 + $0x370] sm:$0xff] %v504_v29  ;;  %v510_v41 = vadd.s32 4294967295, %v254_v38  ;;  %v256_v43 = vld [vmem:[%s1286_s30 + $0x3b0] sm:$0xff]  ;;  %v257_v44 = vld [vmem:[%s1286_s30 + $0x3b8] sm:$0xff]  ;;  %761 = vst [vmem:[%s1296_s27 + $0x378] sm:$0xff] %v505_v33  ;;  %v511_v45 = vadd.s32 4294967295, %v255_v42 }
  0x73   : > { %762 = vst [vmem:[%s1296_s27 + $0x380] sm:$0xff] %v506_v34  ;;  %763 = vst [vmem:[%s1296_s27 + $0x388] sm:$0xff] %v507_v35  ;;  %v512_v46 = vadd.s32 4294967295, %v256_v43  ;;  %v513_v47 = vadd.s32 4294967295, %v257_v44  ;;  %v258_v48 = vld [vmem:[%s1286_s30 + $0x3c0] sm:$0xff]  ;;  %v259_v49 = vld [vmem:[%s1286_s30 + $0x3c8] sm:$0xff] }
  0x74   : > { %v260_v50 = vld [vmem:[%s1286_s30 + $0x3d0] sm:$0xff]  ;;  %764 = vst [vmem:[%s1296_s27 + $0x390] sm:$0xff] %v508_v39  ;;  %765 = vst [vmem:[%s1296_s27 + $0x398] sm:$0xff] %v509_v40  ;;  %v514_v51 = vadd.s32 4294967295, %v258_v48  ;;  %v515_v52 = vadd.s32 4294967295, %v259_v49  ;;  %v261_v54 = vld [vmem:[%s1286_s30 + $0x3d8] sm:$0xff] }
  0x75   : > { %766 = vst [vmem:[%s1296_s27 + $0x3a0] sm:$0xff] %v510_v41  ;;  %v516_v53 = vadd.s32 4294967295, %v260_v50  ;;  %v262_v55 = vld [vmem:[%s1286_s30 + $0x3e0] sm:$0xff]  ;;  %v263_v56 = vld [vmem:[%s1286_s30 + $0x3e8] sm:$0xff]  ;;  %767 = vst [vmem:[%s1296_s27 + $0x3a8] sm:$0xff] %v511_v45  ;;  %v517_v57 = vadd.s32 4294967295, %v261_v54 }
  0x76   : > { %768 = vst [vmem:[%s1296_s27 + $0x3b0] sm:$0xff] %v512_v46  ;;  %769 = vst [vmem:[%s1296_s27 + $0x3b8] sm:$0xff] %v513_v47  ;;  %v518_v58 = vadd.s32 4294967295, %v262_v55  ;;  %v519_v59 = vadd.s32 4294967295, %v263_v56  ;;  %v264_v60 = vld [vmem:[%s1286_s30 + $0x3f0] sm:$0xff]  ;;  %v265_v61 = vld [vmem:[%s1286_s30 + $0x3f8] sm:$0xff] }
  0x77   : > { %v266_v62 = vld [vmem:[%s1286_s30 + $0x400] sm:$0xff]  ;;  %770 = vst [vmem:[%s1296_s27 + $0x3c0] sm:$0xff] %v514_v51  ;;  %771 = vst [vmem:[%s1296_s27 + $0x3c8] sm:$0xff] %v515_v52  ;;  %v520_v63 = vadd.s32 4294967295, %v264_v60  ;;  %v521_v0 = vadd.s32 4294967295, %v265_v61  ;;  %v267_v2 = vld [vmem:[%s1286_s30 + $0x408] sm:$0xff] }
  0x78   : > { %772 = vst [vmem:[%s1296_s27 + $0x3d0] sm:$0xff] %v516_v53  ;;  %v522_v1 = vadd.s32 4294967295, %v266_v62  ;;  %v268_v3 = vld [vmem:[%s1286_s30 + $0x410] sm:$0xff]  ;;  %v269_v4 = vld [vmem:[%s1286_s30 + $0x418] sm:$0xff]  ;;  %773 = vst [vmem:[%s1296_s27 + $0x3d8] sm:$0xff] %v517_v57  ;;  %v523_v5 = vadd.s32 4294967295, %v267_v2 }
  0x79   : > { %774 = vst [vmem:[%s1296_s27 + $0x3e0] sm:$0xff] %v518_v58  ;;  %775 = vst [vmem:[%s1296_s27 + $0x3e8] sm:$0xff] %v519_v59  ;;  %v524_v6 = vadd.s32 4294967295, %v268_v3  ;;  %v525_v7 = vadd.s32 4294967295, %v269_v4  ;;  %v270_v8 = vld [vmem:[%s1286_s30 + $0x420] sm:$0xff]  ;;  %v271_v9 = vld [vmem:[%s1286_s30 + $0x428] sm:$0xff] }
  0x7a   : > { %v272_v10 = vld [vmem:[%s1286_s30 + $0x430] sm:$0xff]  ;;  %776 = vst [vmem:[%s1296_s27 + $0x3f0] sm:$0xff] %v520_v63  ;;  %777 = vst [vmem:[%s1296_s27 + $0x3f8] sm:$0xff] %v521_v0  ;;  %v526_v11 = vadd.s32 4294967295, %v270_v8  ;;  %v527_v12 = vadd.s32 4294967295, %v271_v9  ;;  %v273_v14 = vld [vmem:[%s1286_s30 + $0x438] sm:$0xff] }
  0x7b   : > { %778 = vst [vmem:[%s1296_s27 + $0x400] sm:$0xff] %v522_v1  ;;  %v528_v13 = vadd.s32 4294967295, %v272_v10  ;;  %v274_v15 = vld [vmem:[%s1286_s30 + $0x440] sm:$0xff]  ;;  %v275_v16 = vld [vmem:[%s1286_s30 + $0x448] sm:$0xff]  ;;  %779 = vst [vmem:[%s1296_s27 + $0x408] sm:$0xff] %v523_v5  ;;  %v529_v17 = vadd.s32 4294967295, %v273_v14 }
  0x7c   : > { %780 = vst [vmem:[%s1296_s27 + $0x410] sm:$0xff] %v524_v6  ;;  %781 = vst [vmem:[%s1296_s27 + $0x418] sm:$0xff] %v525_v7  ;;  %v530_v18 = vadd.s32 4294967295, %v274_v15  ;;  %v531_v19 = vadd.s32 4294967295, %v275_v16  ;;  %v276_v20 = vld [vmem:[%s1286_s30 + $0x450] sm:$0xff]  ;;  %v277_v21 = vld [vmem:[%s1286_s30 + $0x458] sm:$0xff] }
  0x7d   : > { %v278_v22 = vld [vmem:[%s1286_s30 + $0x460] sm:$0xff]  ;;  %782 = vst [vmem:[%s1296_s27 + $0x420] sm:$0xff] %v526_v11  ;;  %783 = vst [vmem:[%s1296_s27 + $0x428] sm:$0xff] %v527_v12  ;;  %v532_v23 = vadd.s32 4294967295, %v276_v20  ;;  %v533_v24 = vadd.s32 4294967295, %v277_v21  ;;  %v279_v26 = vld [vmem:[%s1286_s30 + $0x468] sm:$0xff] }
  0x7e   : > { %784 = vst [vmem:[%s1296_s27 + $0x430] sm:$0xff] %v528_v13  ;;  %v534_v25 = vadd.s32 4294967295, %v278_v22  ;;  %v280_v27 = vld [vmem:[%s1286_s30 + $0x470] sm:$0xff]  ;;  %v281_v28 = vld [vmem:[%s1286_s30 + $0x478] sm:$0xff]  ;;  %785 = vst [vmem:[%s1296_s27 + $0x438] sm:$0xff] %v529_v17  ;;  %v535_v29 = vadd.s32 4294967295, %v279_v26 }
  0x7f   : > { %786 = vst [vmem:[%s1296_s27 + $0x440] sm:$0xff] %v530_v18  ;;  %787 = vst [vmem:[%s1296_s27 + $0x448] sm:$0xff] %v531_v19  ;;  %v536_v30 = vadd.s32 4294967295, %v280_v27  ;;  %v537_v31 = vadd.s32 4294967295, %v281_v28  ;;  %v282_v32 = vld [vmem:[%s1286_s30 + $0x480] sm:$0xff]  ;;  %v283_v33 = vld [vmem:[%s1286_s30 + $0x488] sm:$0xff] }
  0x80   : > { %v284_v34 = vld [vmem:[%s1286_s30 + $0x490] sm:$0xff]  ;;  %788 = vst [vmem:[%s1296_s27 + $0x450] sm:$0xff] %v532_v23  ;;  %789 = vst [vmem:[%s1296_s27 + $0x458] sm:$0xff] %v533_v24  ;;  %v538_v35 = vadd.s32 4294967295, %v282_v32  ;;  %v539_v36 = vadd.s32 4294967295, %v283_v33  ;;  %v285_v38 = vld [vmem:[%s1286_s30 + $0x498] sm:$0xff] }
  0x81   : > { %790 = vst [vmem:[%s1296_s27 + $0x460] sm:$0xff] %v534_v25  ;;  %v540_v37 = vadd.s32 4294967295, %v284_v34  ;;  %v286_v39 = vld [vmem:[%s1286_s30 + $0x4a0] sm:$0xff]  ;;  %v287_v40 = vld [vmem:[%s1286_s30 + $0x4a8] sm:$0xff]  ;;  %791 = vst [vmem:[%s1296_s27 + $0x468] sm:$0xff] %v535_v29  ;;  %v541_v41 = vadd.s32 4294967295, %v285_v38 }
  0x82   : > { %792 = vst [vmem:[%s1296_s27 + $0x470] sm:$0xff] %v536_v30  ;;  %793 = vst [vmem:[%s1296_s27 + $0x478] sm:$0xff] %v537_v31  ;;  %v542_v42 = vadd.s32 4294967295, %v286_v39  ;;  %v543_v43 = vadd.s32 4294967295, %v287_v40  ;;  %v288_v44 = vld [vmem:[%s1286_s30 + $0x4b0] sm:$0xff]  ;;  %v289_v45 = vld [vmem:[%s1286_s30 + $0x4b8] sm:$0xff] }
  0x83   : > { %v290_v46 = vld [vmem:[%s1286_s30 + $0x4c0] sm:$0xff]  ;;  %794 = vst [vmem:[%s1296_s27 + $0x480] sm:$0xff] %v538_v35  ;;  %795 = vst [vmem:[%s1296_s27 + $0x488] sm:$0xff] %v539_v36  ;;  %v544_v47 = vadd.s32 4294967295, %v288_v44  ;;  %v545_v48 = vadd.s32 4294967295, %v289_v45  ;;  %v291_v50 = vld [vmem:[%s1286_s30 + $0x4c8] sm:$0xff] }
  0x84   : > { %796 = vst [vmem:[%s1296_s27 + $0x490] sm:$0xff] %v540_v37  ;;  %v546_v49 = vadd.s32 4294967295, %v290_v46  ;;  %v292_v51 = vld [vmem:[%s1286_s30 + $0x4d0] sm:$0xff]  ;;  %v293_v52 = vld [vmem:[%s1286_s30 + $0x4d8] sm:$0xff]  ;;  %797 = vst [vmem:[%s1296_s27 + $0x498] sm:$0xff] %v541_v41  ;;  %v547_v53 = vadd.s32 4294967295, %v291_v50 }
  0x85   : > { %798 = vst [vmem:[%s1296_s27 + $0x4a0] sm:$0xff] %v542_v42  ;;  %799 = vst [vmem:[%s1296_s27 + $0x4a8] sm:$0xff] %v543_v43  ;;  %v548_v54 = vadd.s32 4294967295, %v292_v51  ;;  %v549_v55 = vadd.s32 4294967295, %v293_v52  ;;  %v294_v56 = vld [vmem:[%s1286_s30 + $0x4e0] sm:$0xff]  ;;  %v295_v57 = vld [vmem:[%s1286_s30 + $0x4e8] sm:$0xff] }
  0x86   : > { %v296_v58 = vld [vmem:[%s1286_s30 + $0x4f0] sm:$0xff]  ;;  %800 = vst [vmem:[%s1296_s27 + $0x4b0] sm:$0xff] %v544_v47  ;;  %801 = vst [vmem:[%s1296_s27 + $0x4b8] sm:$0xff] %v545_v48  ;;  %v550_v59 = vadd.s32 4294967295, %v294_v56  ;;  %v551_v60 = vadd.s32 4294967295, %v295_v57  ;;  %v297_v62 = vld [vmem:[%s1286_s30 + $0x4f8] sm:$0xff] }
  0x87   : > { %802 = vst [vmem:[%s1296_s27 + $0x4c0] sm:$0xff] %v546_v49  ;;  %v552_v61 = vadd.s32 4294967295, %v296_v58  ;;  %v298_v63 = vld [vmem:[%s1286_s30 + $0x500] sm:$0xff]  ;;  %v299_v0 = vld [vmem:[%s1286_s30 + $0x508] sm:$0xff]  ;;  %803 = vst [vmem:[%s1296_s27 + $0x4c8] sm:$0xff] %v547_v53  ;;  %v553_v1 = vadd.s32 4294967295, %v297_v62 }
  0x88   : > { %804 = vst [vmem:[%s1296_s27 + $0x4d0] sm:$0xff] %v548_v54  ;;  %805 = vst [vmem:[%s1296_s27 + $0x4d8] sm:$0xff] %v549_v55  ;;  %v554_v2 = vadd.s32 4294967295, %v298_v63  ;;  %v555_v3 = vadd.s32 4294967295, %v299_v0  ;;  %v300_v4 = vld [vmem:[%s1286_s30 + $0x510] sm:$0xff]  ;;  %v301_v5 = vld [vmem:[%s1286_s30 + $0x518] sm:$0xff] }
  0x89   : > { %v302_v6 = vld [vmem:[%s1286_s30 + $0x520] sm:$0xff]  ;;  %806 = vst [vmem:[%s1296_s27 + $0x4e0] sm:$0xff] %v550_v59  ;;  %807 = vst [vmem:[%s1296_s27 + $0x4e8] sm:$0xff] %v551_v60  ;;  %v556_v7 = vadd.s32 4294967295, %v300_v4  ;;  %v557_v8 = vadd.s32 4294967295, %v301_v5  ;;  %v303_v10 = vld [vmem:[%s1286_s30 + $0x528] sm:$0xff] }
  0x8a   : > { %808 = vst [vmem:[%s1296_s27 + $0x4f0] sm:$0xff] %v552_v61  ;;  %v558_v9 = vadd.s32 4294967295, %v302_v6  ;;  %v304_v11 = vld [vmem:[%s1286_s30 + $0x530] sm:$0xff]  ;;  %v305_v12 = vld [vmem:[%s1286_s30 + $0x538] sm:$0xff]  ;;  %809 = vst [vmem:[%s1296_s27 + $0x4f8] sm:$0xff] %v553_v1  ;;  %v559_v13 = vadd.s32 4294967295, %v303_v10 }
  0x8b   : > { %810 = vst [vmem:[%s1296_s27 + $0x500] sm:$0xff] %v554_v2  ;;  %811 = vst [vmem:[%s1296_s27 + $0x508] sm:$0xff] %v555_v3  ;;  %v560_v14 = vadd.s32 4294967295, %v304_v11  ;;  %v561_v15 = vadd.s32 4294967295, %v305_v12  ;;  %v306_v16 = vld [vmem:[%s1286_s30 + $0x540] sm:$0xff]  ;;  %v307_v17 = vld [vmem:[%s1286_s30 + $0x548] sm:$0xff] }
  0x8c   : > { %v308_v18 = vld [vmem:[%s1286_s30 + $0x550] sm:$0xff]  ;;  %812 = vst [vmem:[%s1296_s27 + $0x510] sm:$0xff] %v556_v7  ;;  %813 = vst [vmem:[%s1296_s27 + $0x518] sm:$0xff] %v557_v8  ;;  %v562_v19 = vadd.s32 4294967295, %v306_v16  ;;  %v563_v20 = vadd.s32 4294967295, %v307_v17  ;;  %v309_v22 = vld [vmem:[%s1286_s30 + $0x558] sm:$0xff] }
  0x8d   : > { %814 = vst [vmem:[%s1296_s27 + $0x520] sm:$0xff] %v558_v9  ;;  %v564_v21 = vadd.s32 4294967295, %v308_v18  ;;  %v310_v23 = vld [vmem:[%s1286_s30 + $0x560] sm:$0xff]  ;;  %v311_v24 = vld [vmem:[%s1286_s30 + $0x568] sm:$0xff]  ;;  %815 = vst [vmem:[%s1296_s27 + $0x528] sm:$0xff] %v559_v13  ;;  %v565_v25 = vadd.s32 4294967295, %v309_v22 }
  0x8e   : > { %816 = vst [vmem:[%s1296_s27 + $0x530] sm:$0xff] %v560_v14  ;;  %817 = vst [vmem:[%s1296_s27 + $0x538] sm:$0xff] %v561_v15  ;;  %v566_v26 = vadd.s32 4294967295, %v310_v23  ;;  %v567_v27 = vadd.s32 4294967295, %v311_v24  ;;  %v312_v28 = vld [vmem:[%s1286_s30 + $0x570] sm:$0xff]  ;;  %v313_v29 = vld [vmem:[%s1286_s30 + $0x578] sm:$0xff] }
  0x8f   : > { %v314_v30 = vld [vmem:[%s1286_s30 + $0x580] sm:$0xff]  ;;  %818 = vst [vmem:[%s1296_s27 + $0x540] sm:$0xff] %v562_v19  ;;  %819 = vst [vmem:[%s1296_s27 + $0x548] sm:$0xff] %v563_v20  ;;  %v568_v31 = vadd.s32 4294967295, %v312_v28  ;;  %v569_v32 = vadd.s32 4294967295, %v313_v29  ;;  %v315_v34 = vld [vmem:[%s1286_s30 + $0x588] sm:$0xff] }
  0x90   : > { %820 = vst [vmem:[%s1296_s27 + $0x550] sm:$0xff] %v564_v21  ;;  %v570_v33 = vadd.s32 4294967295, %v314_v30  ;;  %v316_v35 = vld [vmem:[%s1286_s30 + $0x590] sm:$0xff]  ;;  %v317_v36 = vld [vmem:[%s1286_s30 + $0x598] sm:$0xff]  ;;  %821 = vst [vmem:[%s1296_s27 + $0x558] sm:$0xff] %v565_v25  ;;  %v571_v37 = vadd.s32 4294967295, %v315_v34 }
  0x91   : > { %822 = vst [vmem:[%s1296_s27 + $0x560] sm:$0xff] %v566_v26  ;;  %823 = vst [vmem:[%s1296_s27 + $0x568] sm:$0xff] %v567_v27  ;;  %v572_v38 = vadd.s32 4294967295, %v316_v35  ;;  %v573_v39 = vadd.s32 4294967295, %v317_v36  ;;  %v318_v40 = vld [vmem:[%s1286_s30 + $0x5a0] sm:$0xff]  ;;  %v319_v41 = vld [vmem:[%s1286_s30 + $0x5a8] sm:$0xff] }
  0x92   : > { %v320_v42 = vld [vmem:[%s1286_s30 + $0x5b0] sm:$0xff]  ;;  %824 = vst [vmem:[%s1296_s27 + $0x570] sm:$0xff] %v568_v31  ;;  %825 = vst [vmem:[%s1296_s27 + $0x578] sm:$0xff] %v569_v32  ;;  %v574_v43 = vadd.s32 4294967295, %v318_v40  ;;  %v575_v44 = vadd.s32 4294967295, %v319_v41  ;;  %v321_v46 = vld [vmem:[%s1286_s30 + $0x5b8] sm:$0xff] }
  0x93   : > { %826 = vst [vmem:[%s1296_s27 + $0x580] sm:$0xff] %v570_v33  ;;  %v576_v45 = vadd.s32 4294967295, %v320_v42  ;;  %v322_v47 = vld [vmem:[%s1286_s30 + $0x5c0] sm:$0xff]  ;;  %v323_v48 = vld [vmem:[%s1286_s30 + $0x5c8] sm:$0xff]  ;;  %827 = vst [vmem:[%s1296_s27 + $0x588] sm:$0xff] %v571_v37  ;;  %v577_v49 = vadd.s32 4294967295, %v321_v46 }
  0x94   : > { %828 = vst [vmem:[%s1296_s27 + $0x590] sm:$0xff] %v572_v38  ;;  %829 = vst [vmem:[%s1296_s27 + $0x598] sm:$0xff] %v573_v39  ;;  %v578_v50 = vadd.s32 4294967295, %v322_v47  ;;  %v579_v51 = vadd.s32 4294967295, %v323_v48  ;;  %v324_v52 = vld [vmem:[%s1286_s30 + $0x5d0] sm:$0xff]  ;;  %v325_v53 = vld [vmem:[%s1286_s30 + $0x5d8] sm:$0xff] }
  0x95   : > { %v326_v54 = vld [vmem:[%s1286_s30 + $0x5e0] sm:$0xff]  ;;  %830 = vst [vmem:[%s1296_s27 + $0x5a0] sm:$0xff] %v574_v43  ;;  %831 = vst [vmem:[%s1296_s27 + $0x5a8] sm:$0xff] %v575_v44  ;;  %v580_v55 = vadd.s32 4294967295, %v324_v52  ;;  %v581_v56 = vadd.s32 4294967295, %v325_v53  ;;  %v327_v58 = vld [vmem:[%s1286_s30 + $0x5e8] sm:$0xff] }
  0x96   : > { %832 = vst [vmem:[%s1296_s27 + $0x5b0] sm:$0xff] %v576_v45  ;;  %v582_v57 = vadd.s32 4294967295, %v326_v54  ;;  %v328_v59 = vld [vmem:[%s1286_s30 + $0x5f0] sm:$0xff]  ;;  %v329_v60 = vld [vmem:[%s1286_s30 + $0x5f8] sm:$0xff]  ;;  %833 = vst [vmem:[%s1296_s27 + $0x5b8] sm:$0xff] %v577_v49  ;;  %v583_v61 = vadd.s32 4294967295, %v327_v58 }
  0x97   : > { %834 = vst [vmem:[%s1296_s27 + $0x5c0] sm:$0xff] %v578_v50  ;;  %835 = vst [vmem:[%s1296_s27 + $0x5c8] sm:$0xff] %v579_v51  ;;  %v584_v62 = vadd.s32 4294967295, %v328_v59  ;;  %v585_v63 = vadd.s32 4294967295, %v329_v60  ;;  %v330_v0 = vld [vmem:[%s1286_s30 + $0x600] sm:$0xff]  ;;  %v331_v1 = vld [vmem:[%s1286_s30 + $0x608] sm:$0xff] }
  0x98   : > { %v332_v2 = vld [vmem:[%s1286_s30 + $0x610] sm:$0xff]  ;;  %836 = vst [vmem:[%s1296_s27 + $0x5d0] sm:$0xff] %v580_v55  ;;  %837 = vst [vmem:[%s1296_s27 + $0x5d8] sm:$0xff] %v581_v56  ;;  %v586_v3 = vadd.s32 4294967295, %v330_v0  ;;  %v587_v4 = vadd.s32 4294967295, %v331_v1  ;;  %v333_v6 = vld [vmem:[%s1286_s30 + $0x618] sm:$0xff] }
  0x99   : > { %838 = vst [vmem:[%s1296_s27 + $0x5e0] sm:$0xff] %v582_v57  ;;  %v588_v5 = vadd.s32 4294967295, %v332_v2  ;;  %v334_v7 = vld [vmem:[%s1286_s30 + $0x620] sm:$0xff]  ;;  %v335_v8 = vld [vmem:[%s1286_s30 + $0x628] sm:$0xff]  ;;  %839 = vst [vmem:[%s1296_s27 + $0x5e8] sm:$0xff] %v583_v61  ;;  %v589_v9 = vadd.s32 4294967295, %v333_v6 }
  0x9a   : > { %840 = vst [vmem:[%s1296_s27 + $0x5f0] sm:$0xff] %v584_v62  ;;  %841 = vst [vmem:[%s1296_s27 + $0x5f8] sm:$0xff] %v585_v63  ;;  %v590_v10 = vadd.s32 4294967295, %v334_v7  ;;  %v591_v11 = vadd.s32 4294967295, %v335_v8  ;;  %v336_v12 = vld [vmem:[%s1286_s30 + $0x630] sm:$0xff]  ;;  %v337_v13 = vld [vmem:[%s1286_s30 + $0x638] sm:$0xff] }
  0x9b   : > { %v338_v14 = vld [vmem:[%s1286_s30 + $0x640] sm:$0xff]  ;;  %842 = vst [vmem:[%s1296_s27 + $0x600] sm:$0xff] %v586_v3  ;;  %843 = vst [vmem:[%s1296_s27 + $0x608] sm:$0xff] %v587_v4  ;;  %v592_v15 = vadd.s32 4294967295, %v336_v12  ;;  %v593_v16 = vadd.s32 4294967295, %v337_v13  ;;  %v339_v18 = vld [vmem:[%s1286_s30 + $0x648] sm:$0xff] }
  0x9c   : > { %844 = vst [vmem:[%s1296_s27 + $0x610] sm:$0xff] %v588_v5  ;;  %v594_v17 = vadd.s32 4294967295, %v338_v14  ;;  %v340_v19 = vld [vmem:[%s1286_s30 + $0x650] sm:$0xff]  ;;  %v341_v20 = vld [vmem:[%s1286_s30 + $0x658] sm:$0xff]  ;;  %845 = vst [vmem:[%s1296_s27 + $0x618] sm:$0xff] %v589_v9  ;;  %v595_v21 = vadd.s32 4294967295, %v339_v18 }
  0x9d   : > { %846 = vst [vmem:[%s1296_s27 + $0x620] sm:$0xff] %v590_v10  ;;  %847 = vst [vmem:[%s1296_s27 + $0x628] sm:$0xff] %v591_v11  ;;  %v596_v22 = vadd.s32 4294967295, %v340_v19  ;;  %v597_v23 = vadd.s32 4294967295, %v341_v20  ;;  %v342_v24 = vld [vmem:[%s1286_s30 + $0x660] sm:$0xff]  ;;  %v343_v25 = vld [vmem:[%s1286_s30 + $0x668] sm:$0xff] }
  0x9e   : > { %v344_v26 = vld [vmem:[%s1286_s30 + $0x670] sm:$0xff]  ;;  %848 = vst [vmem:[%s1296_s27 + $0x630] sm:$0xff] %v592_v15  ;;  %849 = vst [vmem:[%s1296_s27 + $0x638] sm:$0xff] %v593_v16  ;;  %v598_v27 = vadd.s32 4294967295, %v342_v24  ;;  %v599_v28 = vadd.s32 4294967295, %v343_v25  ;;  %v345_v30 = vld [vmem:[%s1286_s30 + $0x678] sm:$0xff] }
  0x9f   : > { %850 = vst [vmem:[%s1296_s27 + $0x640] sm:$0xff] %v594_v17  ;;  %v600_v29 = vadd.s32 4294967295, %v344_v26  ;;  %v346_v31 = vld [vmem:[%s1286_s30 + $0x680] sm:$0xff]  ;;  %v347_v32 = vld [vmem:[%s1286_s30 + $0x688] sm:$0xff]  ;;  %851 = vst [vmem:[%s1296_s27 + $0x648] sm:$0xff] %v595_v21  ;;  %v601_v33 = vadd.s32 4294967295, %v345_v30 }
  0xa0   : > { %852 = vst [vmem:[%s1296_s27 + $0x650] sm:$0xff] %v596_v22  ;;  %853 = vst [vmem:[%s1296_s27 + $0x658] sm:$0xff] %v597_v23  ;;  %v602_v34 = vadd.s32 4294967295, %v346_v31  ;;  %v603_v35 = vadd.s32 4294967295, %v347_v32  ;;  %v348_v36 = vld [vmem:[%s1286_s30 + $0x690] sm:$0xff]  ;;  %v349_v37 = vld [vmem:[%s1286_s30 + $0x698] sm:$0xff] }
  0xa1   : > { %v350_v38 = vld [vmem:[%s1286_s30 + $0x6a0] sm:$0xff]  ;;  %854 = vst [vmem:[%s1296_s27 + $0x660] sm:$0xff] %v598_v27  ;;  %855 = vst [vmem:[%s1296_s27 + $0x668] sm:$0xff] %v599_v28  ;;  %v604_v39 = vadd.s32 4294967295, %v348_v36  ;;  %v605_v40 = vadd.s32 4294967295, %v349_v37  ;;  %v351_v42 = vld [vmem:[%s1286_s30 + $0x6a8] sm:$0xff] }
  0xa2   : > { %856 = vst [vmem:[%s1296_s27 + $0x670] sm:$0xff] %v600_v29  ;;  %v606_v41 = vadd.s32 4294967295, %v350_v38  ;;  %v352_v43 = vld [vmem:[%s1286_s30 + $0x6b0] sm:$0xff]  ;;  %v353_v44 = vld [vmem:[%s1286_s30 + $0x6b8] sm:$0xff]  ;;  %857 = vst [vmem:[%s1296_s27 + $0x678] sm:$0xff] %v601_v33  ;;  %v607_v45 = vadd.s32 4294967295, %v351_v42 }
  0xa3   : > { %858 = vst [vmem:[%s1296_s27 + $0x680] sm:$0xff] %v602_v34  ;;  %859 = vst [vmem:[%s1296_s27 + $0x688] sm:$0xff] %v603_v35  ;;  %v608_v46 = vadd.s32 4294967295, %v352_v43  ;;  %v609_v47 = vadd.s32 4294967295, %v353_v44  ;;  %v354_v48 = vld [vmem:[%s1286_s30 + $0x6c0] sm:$0xff]  ;;  %v355_v49 = vld [vmem:[%s1286_s30 + $0x6c8] sm:$0xff] }
  0xa4   : > { %v356_v50 = vld [vmem:[%s1286_s30 + $0x6d0] sm:$0xff]  ;;  %860 = vst [vmem:[%s1296_s27 + $0x690] sm:$0xff] %v604_v39  ;;  %861 = vst [vmem:[%s1296_s27 + $0x698] sm:$0xff] %v605_v40  ;;  %v610_v51 = vadd.s32 4294967295, %v354_v48  ;;  %v611_v52 = vadd.s32 4294967295, %v355_v49  ;;  %v357_v54 = vld [vmem:[%s1286_s30 + $0x6d8] sm:$0xff] }
  0xa5   : > { %862 = vst [vmem:[%s1296_s27 + $0x6a0] sm:$0xff] %v606_v41  ;;  %v612_v53 = vadd.s32 4294967295, %v356_v50  ;;  %v358_v55 = vld [vmem:[%s1286_s30 + $0x6e0] sm:$0xff]  ;;  %v359_v56 = vld [vmem:[%s1286_s30 + $0x6e8] sm:$0xff]  ;;  %863 = vst [vmem:[%s1296_s27 + $0x6a8] sm:$0xff] %v607_v45  ;;  %v613_v57 = vadd.s32 4294967295, %v357_v54 }
  0xa6   : > { %864 = vst [vmem:[%s1296_s27 + $0x6b0] sm:$0xff] %v608_v46  ;;  %865 = vst [vmem:[%s1296_s27 + $0x6b8] sm:$0xff] %v609_v47  ;;  %v614_v58 = vadd.s32 4294967295, %v358_v55  ;;  %v615_v59 = vadd.s32 4294967295, %v359_v56  ;;  %v360_v60 = vld [vmem:[%s1286_s30 + $0x6f0] sm:$0xff]  ;;  %v361_v61 = vld [vmem:[%s1286_s30 + $0x6f8] sm:$0xff] }
  0xa7   : > { %v362_v62 = vld [vmem:[%s1286_s30 + $0x700] sm:$0xff]  ;;  %866 = vst [vmem:[%s1296_s27 + $0x6c0] sm:$0xff] %v610_v51  ;;  %867 = vst [vmem:[%s1296_s27 + $0x6c8] sm:$0xff] %v611_v52  ;;  %v616_v63 = vadd.s32 4294967295, %v360_v60  ;;  %v617_v0 = vadd.s32 4294967295, %v361_v61  ;;  %v363_v2 = vld [vmem:[%s1286_s30 + $0x708] sm:$0xff] }
  0xa8   : > { %868 = vst [vmem:[%s1296_s27 + $0x6d0] sm:$0xff] %v612_v53  ;;  %v618_v1 = vadd.s32 4294967295, %v362_v62  ;;  %v364_v3 = vld [vmem:[%s1286_s30 + $0x710] sm:$0xff]  ;;  %v365_v4 = vld [vmem:[%s1286_s30 + $0x718] sm:$0xff]  ;;  %869 = vst [vmem:[%s1296_s27 + $0x6d8] sm:$0xff] %v613_v57  ;;  %v619_v5 = vadd.s32 4294967295, %v363_v2 }
  0xa9   : > { %870 = vst [vmem:[%s1296_s27 + $0x6e0] sm:$0xff] %v614_v58  ;;  %871 = vst [vmem:[%s1296_s27 + $0x6e8] sm:$0xff] %v615_v59  ;;  %v620_v6 = vadd.s32 4294967295, %v364_v3  ;;  %v621_v7 = vadd.s32 4294967295, %v365_v4  ;;  %v366_v8 = vld [vmem:[%s1286_s30 + $0x720] sm:$0xff]  ;;  %v367_v9 = vld [vmem:[%s1286_s30 + $0x728] sm:$0xff] }
  0xaa   : > { %v368_v10 = vld [vmem:[%s1286_s30 + $0x730] sm:$0xff]  ;;  %872 = vst [vmem:[%s1296_s27 + $0x6f0] sm:$0xff] %v616_v63  ;;  %873 = vst [vmem:[%s1296_s27 + $0x6f8] sm:$0xff] %v617_v0  ;;  %v622_v11 = vadd.s32 4294967295, %v366_v8  ;;  %v623_v12 = vadd.s32 4294967295, %v367_v9  ;;  %v369_v14 = vld [vmem:[%s1286_s30 + $0x738] sm:$0xff] }
  0xab   : > { %874 = vst [vmem:[%s1296_s27 + $0x700] sm:$0xff] %v618_v1  ;;  %v624_v13 = vadd.s32 4294967295, %v368_v10  ;;  %v370_v15 = vld [vmem:[%s1286_s30 + $0x740] sm:$0xff]  ;;  %v371_v16 = vld [vmem:[%s1286_s30 + $0x748] sm:$0xff]  ;;  %875 = vst [vmem:[%s1296_s27 + $0x708] sm:$0xff] %v619_v5  ;;  %v625_v17 = vadd.s32 4294967295, %v369_v14 }
  0xac   : > { %876 = vst [vmem:[%s1296_s27 + $0x710] sm:$0xff] %v620_v6  ;;  %877 = vst [vmem:[%s1296_s27 + $0x718] sm:$0xff] %v621_v7  ;;  %v626_v18 = vadd.s32 4294967295, %v370_v15  ;;  %v627_v19 = vadd.s32 4294967295, %v371_v16  ;;  %v372_v20 = vld [vmem:[%s1286_s30 + $0x750] sm:$0xff]  ;;  %v373_v21 = vld [vmem:[%s1286_s30 + $0x758] sm:$0xff] }
  0xad   : > { %v374_v22 = vld [vmem:[%s1286_s30 + $0x760] sm:$0xff]  ;;  %878 = vst [vmem:[%s1296_s27 + $0x720] sm:$0xff] %v622_v11  ;;  %879 = vst [vmem:[%s1296_s27 + $0x728] sm:$0xff] %v623_v12  ;;  %v628_v23 = vadd.s32 4294967295, %v372_v20  ;;  %v629_v24 = vadd.s32 4294967295, %v373_v21  ;;  %v375_v26 = vld [vmem:[%s1286_s30 + $0x768] sm:$0xff] }
  0xae   : > { %880 = vst [vmem:[%s1296_s27 + $0x730] sm:$0xff] %v624_v13  ;;  %v630_v25 = vadd.s32 4294967295, %v374_v22  ;;  %v376_v27 = vld [vmem:[%s1286_s30 + $0x770] sm:$0xff]  ;;  %v377_v28 = vld [vmem:[%s1286_s30 + $0x778] sm:$0xff]  ;;  %881 = vst [vmem:[%s1296_s27 + $0x738] sm:$0xff] %v625_v17  ;;  %v631_v29 = vadd.s32 4294967295, %v375_v26 }
  0xaf   : > { %882 = vst [vmem:[%s1296_s27 + $0x740] sm:$0xff] %v626_v18  ;;  %883 = vst [vmem:[%s1296_s27 + $0x748] sm:$0xff] %v627_v19  ;;  %v632_v30 = vadd.s32 4294967295, %v376_v27  ;;  %v633_v31 = vadd.s32 4294967295, %v377_v28  ;;  %v378_v32 = vld [vmem:[%s1286_s30 + $0x780] sm:$0xff]  ;;  %v379_v33 = vld [vmem:[%s1286_s30 + $0x788] sm:$0xff] }
  0xb0   : > { %v380_v34 = vld [vmem:[%s1286_s30 + $0x790] sm:$0xff]  ;;  %884 = vst [vmem:[%s1296_s27 + $0x750] sm:$0xff] %v628_v23  ;;  %885 = vst [vmem:[%s1296_s27 + $0x758] sm:$0xff] %v629_v24  ;;  %v634_v35 = vadd.s32 4294967295, %v378_v32  ;;  %v635_v36 = vadd.s32 4294967295, %v379_v33  ;;  %v381_v38 = vld [vmem:[%s1286_s30 + $0x798] sm:$0xff] }
  0xb1   : > { %886 = vst [vmem:[%s1296_s27 + $0x760] sm:$0xff] %v630_v25  ;;  %v636_v37 = vadd.s32 4294967295, %v380_v34  ;;  %v382_v39 = vld [vmem:[%s1286_s30 + $0x7a0] sm:$0xff]  ;;  %v383_v40 = vld [vmem:[%s1286_s30 + $0x7a8] sm:$0xff]  ;;  %887 = vst [vmem:[%s1296_s27 + $0x768] sm:$0xff] %v631_v29  ;;  %v637_v41 = vadd.s32 4294967295, %v381_v38 }
  0xb2   : > { %888 = vst [vmem:[%s1296_s27 + $0x770] sm:$0xff] %v632_v30  ;;  %889 = vst [vmem:[%s1296_s27 + $0x778] sm:$0xff] %v633_v31  ;;  %v638_v42 = vadd.s32 4294967295, %v382_v39  ;;  %v639_v43 = vadd.s32 4294967295, %v383_v40  ;;  %v384_v44 = vld [vmem:[%s1286_s30 + $0x7b0] sm:$0xff]  ;;  %v385_v45 = vld [vmem:[%s1286_s30 + $0x7b8] sm:$0xff] }
  0xb3   : > { %v386_v46 = vld [vmem:[%s1286_s30 + $0x7c0] sm:$0xff]  ;;  %890 = vst [vmem:[%s1296_s27 + $0x780] sm:$0xff] %v634_v35  ;;  %891 = vst [vmem:[%s1296_s27 + $0x788] sm:$0xff] %v635_v36  ;;  %v640_v47 = vadd.s32 4294967295, %v384_v44  ;;  %v641_v48 = vadd.s32 4294967295, %v385_v45  ;;  %v387_v50 = vld [vmem:[%s1286_s30 + $0x7c8] sm:$0xff] }
  0xb4   : > { %892 = vst [vmem:[%s1296_s27 + $0x790] sm:$0xff] %v636_v37  ;;  %v642_v49 = vadd.s32 4294967295, %v386_v46  ;;  %v388_v51 = vld [vmem:[%s1286_s30 + $0x7d0] sm:$0xff]  ;;  %v389_v52 = vld [vmem:[%s1286_s30 + $0x7d8] sm:$0xff]  ;;  %893 = vst [vmem:[%s1296_s27 + $0x798] sm:$0xff] %v637_v41  ;;  %v643_v53 = vadd.s32 4294967295, %v387_v50 }
  0xb5   : > { %894 = vst [vmem:[%s1296_s27 + $0x7a0] sm:$0xff] %v638_v42  ;;  %895 = vst [vmem:[%s1296_s27 + $0x7a8] sm:$0xff] %v639_v43  ;;  %v644_v54 = vadd.s32 4294967295, %v388_v51  ;;  %v645_v55 = vadd.s32 4294967295, %v389_v52  ;;  %v390_v56 = vld [vmem:[%s1286_s30 + $0x7e0] sm:$0xff]  ;;  %v391_v57 = vld [vmem:[%s1286_s30 + $0x7e8] sm:$0xff] }
  0xb6   : > { %v392_v58 = vld [vmem:[%s1286_s30 + $0x7f0] sm:$0xff]  ;;  %896 = vst [vmem:[%s1296_s27 + $0x7b0] sm:$0xff] %v640_v47  ;;  %897 = vst [vmem:[%s1296_s27 + $0x7b8] sm:$0xff] %v641_v48  ;;  %v646_v59 = vadd.s32 4294967295, %v390_v56  ;;  %v647_v60 = vadd.s32 4294967295, %v391_v57  ;;  %v393_v62 = vld [vmem:[%s1286_s30 + $0x7f8] sm:$0xff] }
  0xb7   : > { %898 = vst [vmem:[%s1296_s27 + $0x7c0] sm:$0xff] %v642_v49  ;;  %v648_v61 = vadd.s32 4294967295, %v392_v58  ;;  %899 = vst [vmem:[%s1296_s27 + $0x7c8] sm:$0xff] %v643_v53  ;;  %v649_v63 = vadd.s32 4294967295, %v393_v62  ;;  %s907_s10 = scalar_lea.sflag [#allocation4], %s1282_s23  ;;  %s1094_s3 = scalar_lea.vmem %s1810_s17, 32768 }
  0xb8   : > { %900 = vst [vmem:[%s1296_s27 + $0x7d0] sm:$0xff] %v644_v54  ;;  %901 = vst [vmem:[%s1296_s27 + $0x7d8] sm:$0xff] %v645_v55  ;;  %p1095_p6 = scmp.ne.s32.totalorder %s1810_s17, %s1094_s3  ;;  %p1869_p11 = scmp.ne.s32.totalorder %s1866_s18, 0 }
  0xb9   : > { %902 = vst [vmem:[%s1296_s27 + $0x7e0] sm:$0xff] %v646_v59  ;;  %903 = vst [vmem:[%s1296_s27 + $0x7e8] sm:$0xff] %v647_v60  ;;  %s1165_s4 = smov [#allocation5]  }
  0xba   : > { %904 = vst [vmem:[%s1296_s27 + $0x7f0] sm:$0xff] %v648_v61  ;;  %905 = vst [vmem:[%s1296_s27 + $0x7f8] sm:$0xff] %v649_v63  ;;  %p1096_p12 = pnand %p1095_p6, %p1869_p11  ;;  %s1098_s5 = sshll.u32 %s1165_s4, 4  ;;  %s1099_s5 = int_to_ptr.vmem [resolvable:$false] %s1098_s5 }
  0xbb   : > { %s1100_s11 = scalar_lea.vmem %s1099_s5, 65536  ;;  %p1101_p8 = scmp.lt.s32.totalorder %s1810_s17, %s1099_s5 }
  0xbc   : > { %p1097_p13 = pneg %p1096_p12  ;;  %p1102_p10 = scmp.lt.s32.totalorder %s1100_s11, %s1094_s3 }
  0xbe   : > { %p1103_p0 = por %p1102_p10, %p1101_p8 }
  0xc0   : > { %p1104_p2 = pnand %p1103_p0, %p1097_p13 }
  0xc2   : > { %1107 = shalt.err (!%p1104_p2)
}
  0xc3   : > { %s1108_s13 = scalar_lea.hbm %s1806_s2, 32768  ;;  %s1112_s20 = scalar_lea.hbm %s1862_s1, 65536 }
  0xc4   : > { %p1109_p4 = scmp.ne.s32.totalorder %s1806_s2, %s1108_s13  ;;  %p1113_p9 = scmp.lt.u32.totalorder %s1806_s2, %s1862_s1 }
  0xc5   : > { %p1114_p1 = scmp.lt.u32.totalorder %s1112_s20, %s1108_s13  ;;  %p1116_p6 = scmp.lt.u32.totalorder %s1108_s13, %s1806_s2 }
  0xc6   : > { %p1110_p5 = pnand %p1109_p4, %p1869_p11 }
  0xc7   : > { %p1115_p3 = por %p1114_p1, %p1113_p9 }
  0xc8   : > { %p1111_p7 = pneg %p1110_p5 }
  0xc9   : > { %p1117_p12 = por %p1116_p6, %p1115_p3 }
  0xcb   : > { %p1118_p13 = pnand %p1117_p12, %p1111_p7 }
  0xcd   : > { %1121 = shalt.err (!%p1118_p13)
}
  0xce   : > { %s1166_s24 = smov 16384   ;;  %s1167_s26 = smov 1024  }
  0xcf   : > { %1016 = dma.vmem_to_hbm [thread:$0]  (%p1869_p11), %s1810_s17, 32768, %s1806_s2, %s907_s10, %s1166_s24, %s1166_s24, %s1167_s26  }
  0xd0 PF: > { %s936_s30 = sand.u32 1, %s1148_s6   ;;  %p1870_p8 = scmp.ne.s32.totalorder %s1867_s19, 0 }
  0xd1   : > { %p1871_p10 = scmp.ge.s32.totalorder %s1160_s9, 2  ;;  %s937_s25 = scalar_lea.sflag [#allocation4], %s936_s30 }
  0xd3   : > { %p1023_p0 = pnand %p1871_p10, %p1870_p8 }
  0xd5   : > { %1143 = dma.done.wait (!%p1023_p0), %s937_s25, 32768  }
  0xd6   : > { %1145 = vsyncadd (!%p1023_p0), %s937_s25, 4294934528  ;;  %p14_p2 = scmp.ge.s32.totalorder %s1203_s12, 4   ;;  %s1872_s6 = smov %s1152_s7 }
  0xd7   : > { %s1873_s7 = smov %s1156_s8  ;;  %s1874_s8 = smov %s1215_s15 }
  0xd8   : > { %s1875_s9 = smov %s1203_s12  ;;  %16 = sbr.rel (!%p14_p2) target bundleno = 5 (0x5), region = 69 }
  0xdf   :  { %942 = vsyncpa [#allocation3], 1 }
  0xe0   :  { %944 = vsyncpa [#allocation3 + $0x1], 1 }
  0xe1   :  { %945 = vsyncpa [#allocation4], 1 }
  0xe2   :  { %947 = vsyncpa [#allocation4 + $0x1], 1 }

</bundles_post_ra>
